<compile_context>
chip_gen: v7x
topology: tpu7x:2x2x1
jax: 0.10.0
libtpu: 0.0.40
codegen_flags: <defaults>
</compile_context>

<pallas_src>
import functools

import jax
import jax.numpy as jnp
from jax.experimental import pallas as pl
from jax.experimental.pallas import tpu as pltpu


# --------------------------------- kernel helpers -------------------------------

def _layer_norm(x, gamma, beta, eps):
    # PyTorch nn.LayerNorm over last dim, biased variance.
    mu = jnp.mean(x, axis=-1, keepdims=True)
    xc = x - mu
    var = jnp.mean(xc * xc, axis=-1, keepdims=True)
    inv = jax.lax.rsqrt(var + eps)
    return xc * inv * gamma + beta


def _softmax_lastdim(scores):
    scores = scores - jnp.max(scores, axis=-1, keepdims=True)
    p = jnp.exp(scores)
    denom = jnp.sum(p, axis=-1, keepdims=True)
    r = pl.reciprocal(denom, approx=True)   # EUP slot, ~free next to the exp
    r = r * (2.0 - denom * r)               # one Newton step -> ~f32-accurate
    return p * r


# ------------------------------------- kernel -----------------------------------

def encoder_stack_kernel(
    x_ref, mask_ref,
    wqkv_ref, vec_ref, wo_ref, wi_ref, wo2_ref,
    out_ref,
    *, seq, hidden, num_heads, head_dim, inter, eps,
):
    l = pl.program_id(1)

    # Layer 0: load this batch block's input into the resident output/carry block.
    @pl.when(l == 0)
    def _():
        out_ref[...] = x_ref[...]

    x = out_ref[0]                         # (S, H) f32 activation carry
    x_b = x.astype(jnp.bfloat16)

    # Packed per-layer vectors (f32): rows of the (1, 10, W) block.
    def vec(i, n):
        return vec_ref[0, i:i + 1, :n]     # (1, n)

    bq, bk, bv = vec(0, hidden), vec(1, hidden), vec(2, hidden)
    bo = vec(3, hidden)
    ln1g, ln1b = vec(4, hidden), vec(5, hidden)
    bi = vec(6, inter)
    bo2 = vec(7, hidden)
    ln2g, ln2b = vec(8, hidden), vec(9, hidden)

    # --- Q/K/V projections: bf16 weights, f32 accumulation ---
    q = jnp.dot(x_b, wqkv_ref[0, 0], preferred_element_type=jnp.float32) + bq
    k = jnp.dot(x_b, wqkv_ref[0, 1], preferred_element_type=jnp.float32) + bk
    v = jnp.dot(x_b, wqkv_ref[0, 2], preferred_element_type=jnp.float32) + bv

    # --- self attention, batched over heads with dot_general (no python loops) ---
    qh = q.reshape(seq, num_heads, head_dim)
    kh = k.reshape(seq, num_heads, head_dim)
    vh = v.reshape(seq, num_heads, head_dim)

    scale = 1.0 / float(head_dim) ** 0.5
    scores = jnp.einsum("qhd,khd->hqk", qh, kh,
                        preferred_element_type=jnp.float32) * scale   # (nh, S, S)
    scores = scores + mask_ref[0]                                      # (1, S) key mask
    probs = _softmax_lastdim(scores)
    ctx = jnp.einsum("hqk,khd->hqd", probs, vh,
                     preferred_element_type=jnp.float32)               # (nh, S, hd)
    ctx = jnp.swapaxes(ctx, 0, 1).reshape(seq, hidden)                 # (S, H) lane-dense

    # --- attention output projection + residual + LayerNorm ---
    attn = jnp.dot(ctx.astype(jnp.bfloat16), wo_ref[0],
                   preferred_element_type=jnp.float32) + bo
    h1 = _layer_norm(attn + x, ln1g, ln1b, eps)

    # --- feed-forward (ReLU) + residual + LayerNorm ---
    inter_act = jnp.dot(h1.astype(jnp.bfloat16), wi_ref[0],
                        preferred_element_type=jnp.float32) + bi
    inter_act = jnp.maximum(inter_act, 0.0)
    ff = jnp.dot(inter_act.astype(jnp.bfloat16), wo2_ref[0],
                 preferred_element_type=jnp.float32) + bo2
    out = _layer_norm(ff + h1, ln2g, ln2b, eps)

    # carry to next layer; the resident output block is written back to HBM once.
    out_ref[0] = out


# ------------------------------------ wrapper ------------------------------------

def _pack_params(layer_params, hidden, inter):
    """bf16 weight stacks + one packed f32 (L, 10, W) array of all small vectors."""
    W = max(hidden, inter)

    def row(v, n):
        return jnp.pad(v.reshape(-1).astype(jnp.float32), (0, W - n))

    vec_rows = []
    for p in layer_params:
        vec_rows.append(jnp.stack([
            row(p["bq"], hidden), row(p["bk"], hidden), row(p["bv"], hidden),
            row(p["bo"], hidden), row(p["ln1g"], hidden), row(p["ln1b"], hidden),
            row(p["bi"], inter), row(p["bo2"], hidden),
            row(p["ln2g"], hidden), row(p["ln2b"], hidden)], axis=0))
    vecs = jnp.stack(vec_rows, axis=0)                                     # (L, 10, W)

    wqkv = jnp.stack([jnp.stack([p["wq"], p["wk"], p["wv"]], axis=0)
                      for p in layer_params], axis=0).astype(jnp.bfloat16)  # (L,3,H,H)
    stk = lambda n: jnp.stack([p[n] for p in layer_params]).astype(jnp.bfloat16)
    return dict(wqkv=wqkv, vecs=vecs, wo=stk("wo"), wi=stk("wi"), wo2=stk("wo2"))


def _vmem_budget_bytes(S, H, I, num_heads):
    bf16, f32 = 2, 4
    W = max(H, I)
    w_layer = bf16 * (4 * H * H + 2 * H * I) + f32 * 10 * W
    resident = f32 * (2 * S * H + S)                     # x block, out/carry, mask
    temps = f32 * (S * (4 * H + I) + 2 * num_heads * S * S + 4 * S * H)
    need = 2 * w_layer + 2 * resident + temps            # inputs/output double-buffered
    # keep >= the usual 32 MiB scoped default; cap below v7x's 64 MiB physical
    return int(min(48 * 2 ** 20, max(32 * 2 ** 20, 2 * need)))


def transformer_encoder_pallas(hidden_states, attention_mask, layer_params,
                               *, num_heads, eps=1e-12):
    """Full encoder stack. attention_mask: (B, S) with 1=attend, 0=ignore."""
    B, S, H = hidden_states.shape
    L = len(layer_params)
    I = layer_params[0]["wi"].shape[1]
    head_dim = H // num_heads
    W = max(H, I)

    # get_extended_attention_mask: (B, S) -> additive mask broadcast over heads/queries.
    mask_add = (1.0 - attention_mask.astype(jnp.float32))[:, None, :] * -10000.0
    x = hidden_states.astype(jnp.float32)
    p = _pack_params(layer_params, H, I)

    kernel = functools.partial(
        encoder_stack_kernel, seq=S, hidden=H, num_heads=num_heads,
        head_dim=head_dim, inter=I, eps=eps)

    out = pl.pallas_call(
        kernel,
        out_shape=jax.ShapeDtypeStruct((B, S, H), jnp.float32),
        grid_spec=pltpu.PrefetchScalarGridSpec(
            num_scalar_prefetch=0,
            grid=(B, L),
            in_specs=[
                pl.BlockSpec((1, S, H), lambda b, l: (b, 0, 0)),      # activations
                pl.BlockSpec((1, 1, S), lambda b, l: (b, 0, 0)),      # additive mask
                pl.BlockSpec((1, 3, H, H), lambda b, l: (l, 0, 0, 0)),  # Wq/Wk/Wv
                pl.BlockSpec((1, 10, W), lambda b, l: (l, 0, 0)),     # packed vectors
                pl.BlockSpec((1, H, H), lambda b, l: (l, 0, 0)),      # Wo
                pl.BlockSpec((1, H, I), lambda b, l: (l, 0, 0)),      # Wi
                pl.BlockSpec((1, I, H), lambda b, l: (l, 0, 0)),      # Wo2
            ],
            out_specs=pl.BlockSpec((1, S, H), lambda b, l: (b, 0, 0)),
        ),
        compiler_params=pltpu.CompilerParams(
            dimension_semantics=("parallel", "arbitrary"),
            vmem_limit_bytes=_vmem_budget_bytes(S, H, I, num_heads)),
    )(x, mask_add, p["wqkv"], p["vecs"], p["wo"], p["wi"], p["wo2"])
    return out  # last_hidden_state


# ----------------------- pure-JAX reference (for verification) -----------------

def _ref_layer(x, mask_add, p, num_heads, eps):
    B, S, H = x.shape
    hd = H // num_heads
    q = x @ p["wq"] + p["bq"][0]
    k = x @ p["wk"] + p["bk"][0]
    v = x @ p["wv"] + p["bv"][0]

    def split(t):  # (B,S,H) -> (B,nh,S,hd)
        return t.reshape(B, S, num_heads, hd).transpose(0, 2, 1, 3)

    qh, kh, vh = split(q), split(k), split(v)
    scores = jnp.einsum("bnqd,bnkd->bnqk", qh, kh) / (hd ** 0.5)
    scores = scores + mask_add[:, None, :, :]
    probs = jax.nn.softmax(scores, axis=-1)
    ctx = jnp.einsum("bnqk,bnkd->bnqd", probs, vh)
    ctx = ctx.transpose(0, 2, 1, 3).reshape(B, S, H)

    def ln(t, g, b):
        mu = jnp.mean(t, -1, keepdims=True)
        var = jnp.mean((t - mu) ** 2, -1, keepdims=True)
        return (t - mu) / jnp.sqrt(var + eps) * g[0] + b[0]

    attn = ctx @ p["wo"] + p["bo"][0]
    h1 = ln(attn + x, p["ln1g"], p["ln1b"])
    inter = jax.nn.relu(h1 @ p["wi"] + p["bi"][0])
    ff = inter @ p["wo2"] + p["bo2"][0]
    return ln(ff + h1, p["ln2g"], p["ln2b"])


def _ref_encoder(x, attention_mask, layer_params, num_heads, eps=1e-12):
    mask_add = (1.0 - attention_mask.astype(jnp.float32))[:, None, :] * -10000.0
    for p in layer_params:
        x = _ref_layer(x, mask_add, p, num_heads, eps)
    return x


# -------------------------------- parameter init -------------------------------

def init_layer_params(key, hidden, intermediate):
    keys = jax.random.split(key, 8)
    std = 0.02
    return {
        "wq": std * jax.random.normal(keys[0], (hidden, hidden), jnp.float32),
        "bq": jnp.zeros((1, hidden), jnp.float32),
        "wk": std * jax.random.normal(keys[1], (hidden, hidden), jnp.float32),
        "bk": jnp.zeros((1, hidden), jnp.float32),
        "wv": std * jax.random.normal(keys[2], (hidden, hidden), jnp.float32),
        "bv": jnp.zeros((1, hidden), jnp.float32),
        "wo": std * jax.random.normal(keys[3], (hidden, hidden), jnp.float32),
        "bo": jnp.zeros((1, hidden), jnp.float32),
        "ln1g": jnp.ones((1, hidden), jnp.float32),
        "ln1b": jnp.zeros((1, hidden), jnp.float32),
        "wi": std * jax.random.normal(keys[4], (hidden, intermediate), jnp.float32),
        "bi": jnp.zeros((1, intermediate), jnp.float32),
        "wo2": std * jax.random.normal(keys[5], (intermediate, hidden), jnp.float32),
        "bo2": jnp.zeros((1, hidden), jnp.float32),
        "ln2g": jnp.ones((1, hidden), jnp.float32),
        "ln2b": jnp.zeros((1, hidden), jnp.float32),
    }


if __name__ == "__main__":
    # Small config consistent with the module's forward:
    # hidden_size=32, num_hidden_layers=2, num_attention_heads=4,
    # intermediate_size=64, hidden_act='relu', layer_norm_eps=1e-12.
    B, S, H, I = 2, 8, 32, 64
    NUM_HEADS = 4
    NUM_LAYERS = 2
    EPS = 1e-12

    root = jax.random.PRNGKey(0)
    k_x, k_p = jax.random.split(root)
    hidden_states = jax.random.normal(k_x, (B, S, H), jnp.float32)

    # attention_mask (B, S): 1 = attend, 0 = ignore (last 2 tokens of batch 1).
    attention_mask = jnp.ones((B, S), jnp.float32)
    attention_mask = attention_mask.at[1, -2:].set(0.0)

    layer_keys = jax.random.split(k_p, NUM_LAYERS)
    layer_params = [init_layer_params(k, H, I) for k in layer_keys]

    out = transformer_encoder_pallas(
        hidden_states, attention_mask, layer_params, num_heads=NUM_HEADS, eps=EPS)
    out = jax.block_until_ready(out)

    ref = _ref_encoder(hidden_states, attention_mask, layer_params, NUM_HEADS, EPS)
    assert out.shape == (B, S, H)
    assert jnp.all(jnp.isfinite(out))
    # bf16 weight streaming: compare against the f32 reference with a matching tolerance.
    assert jnp.allclose(out, ref, atol=2e-2, rtol=2e-2), (
        float(jnp.max(jnp.abs(out - ref))))

    # TODO(synk): dropout (hidden_dropout_prob / attention_probs_dropout_prob) is
    # identity (eval-mode); output_attentions / output_hidden_states / past_key_values
    # are not returned (only last_hidden_state).
    print("KERNEL_OK")
</pallas_src>

<mosaic_0001>
module attributes {stable_mosaic.version = 11 : i64} {
  func.func @encoder_stack_kernel(%arg0: i32, %arg1: i32, %arg2: memref<1x8x32xf32, #tpu.memory_space<vmem>>, %arg3: memref<1x1x8xf32, #tpu.memory_space<vmem>>, %arg4: memref<1x3x32x32xbf16, #tpu.memory_space<vmem>>, %arg5: memref<1x10x64xf32, #tpu.memory_space<vmem>>, %arg6: memref<1x32x32xbf16, #tpu.memory_space<vmem>>, %arg7: memref<1x32x64xbf16, #tpu.memory_space<vmem>>, %arg8: memref<1x64x32xbf16, #tpu.memory_space<vmem>>, %arg9: memref<1x8x32xf32, #tpu.memory_space<vmem>>) attributes {dimension_semantics = [#tpu.dimension_semantics<parallel>, #tpu.dimension_semantics<arbitrary>], iteration_bounds = array<i64: 2, 2>, scalar_prefetch = 0 : i64, scratch_operands = 0 : i64, tpu.core_type = #tpu.core_type<tc>, window_params = [{transform_indices = @transform_0, window_bounds = array<i64: 1, 8, 32>}, {transform_indices = @transform_1, window_bounds = array<i64: 1, 1, 8>}, {transform_indices = @transform_2, window_bounds = array<i64: 1, 3, 32, 32>}, {transform_indices = @transform_3, window_bounds = array<i64: 1, 10, 64>}, {transform_indices = @transform_4, window_bounds = array<i64: 1, 32, 32>}, {transform_indices = @transform_5, window_bounds = array<i64: 1, 32, 64>}, {transform_indices = @transform_6, window_bounds = array<i64: 1, 64, 32>}, {transform_indices = @transform_7, window_bounds = array<i64: 1, 8, 32>}]} {
    %c0_i32 = arith.constant 0 : i32
    %0 = arith.cmpi eq, %arg1, %c0_i32 : i32
    %1 = arith.extui %0 : i1 to i32
    %c0_i32_0 = arith.constant 0 : i32
    %2 = arith.cmpi ne, %1, %c0_i32_0 : i32
    scf.if %2 {
      %c0_73 = arith.constant 0 : index
      %c0_74 = arith.constant 0 : index
      %c0_75 = arith.constant 0 : index
      %134 = vector.load %arg2[%c0_73, %c0_74, %c0_75] : memref<1x8x32xf32, #tpu.memory_space<vmem>>, vector<1x8x32xf32>
      %c0_76 = arith.constant 0 : index
      %c0_77 = arith.constant 0 : index
      %c0_78 = arith.constant 0 : index
      %135 = vector.load %arg9[%c0_76, %c0_77, %c0_78] : memref<1x8x32xf32, #tpu.memory_space<vmem>>, vector<1x8x32xf32>
      tpu.vector_store %arg9[%c0_76, %c0_77, %c0_78], %134 {strides = array<i32>} : memref<1x8x32xf32, #tpu.memory_space<vmem>>, vector<1x8x32xf32>,
    } else {
    }
    %c0 = arith.constant 0 : index
    %c0_1 = arith.constant 0 : index
    %c0_2 = arith.constant 0 : index
    %3 = vector.load %arg9[%c0, %c0_1, %c0_2] : memref<1x8x32xf32, #tpu.memory_space<vmem>>, vector<1x8x32xf32>
    %4 = vector.shape_cast %3 : vector<1x8x32xf32> to vector<8x32xf32>
    %5 = arith.truncf %4 : vector<8x32xf32> to vector<8x32xbf16>
    %c0_3 = arith.constant 0 : index
    %c0_4 = arith.constant 0 : index
    %c0_5 = arith.constant 0 : index
    %6 = vector.load %arg5[%c0_3, %c0_4, %c0_5] : memref<1x10x64xf32, #tpu.memory_space<vmem>>, vector<1x1x32xf32>
    %7 = vector.shape_cast %6 : vector<1x1x32xf32> to vector<1x32xf32>
    %c0_6 = arith.constant 0 : index
    %c1 = arith.constant 1 : index
    %c0_7 = arith.constant 0 : index
    %8 = vector.load %arg5[%c0_6, %c1, %c0_7] : memref<1x10x64xf32, #tpu.memory_space<vmem>>, vector<1x1x32xf32>
    %9 = vector.shape_cast %8 : vector<1x1x32xf32> to vector<1x32xf32>
    %c0_8 = arith.constant 0 : index
    %c2 = arith.constant 2 : index
    %c0_9 = arith.constant 0 : index
    %10 = vector.load %arg5[%c0_8, %c2, %c0_9] : memref<1x10x64xf32, #tpu.memory_space<vmem>>, vector<1x1x32xf32>
    %11 = vector.shape_cast %10 : vector<1x1x32xf32> to vector<1x32xf32>
    %c0_10 = arith.constant 0 : index
    %c3 = arith.constant 3 : index
    %c0_11 = arith.constant 0 : index
    %12 = vector.load %arg5[%c0_10, %c3, %c0_11] : memref<1x10x64xf32, #tpu.memory_space<vmem>>, vector<1x1x32xf32>
    %13 = vector.shape_cast %12 : vector<1x1x32xf32> to vector<1x32xf32>
    %c0_12 = arith.constant 0 : index
    %c4 = arith.constant 4 : index
    %c0_13 = arith.constant 0 : index
    %14 = vector.load %arg5[%c0_12, %c4, %c0_13] : memref<1x10x64xf32, #tpu.memory_space<vmem>>, vector<1x1x32xf32>
    %15 = vector.shape_cast %14 : vector<1x1x32xf32> to vector<1x32xf32>
    %c0_14 = arith.constant 0 : index
    %c5 = arith.constant 5 : index
    %c0_15 = arith.constant 0 : index
    %16 = vector.load %arg5[%c0_14, %c5, %c0_15] : memref<1x10x64xf32, #tpu.memory_space<vmem>>, vector<1x1x32xf32>
    %17 = vector.shape_cast %16 : vector<1x1x32xf32> to vector<1x32xf32>
    %c0_16 = arith.constant 0 : index
    %c6 = arith.constant 6 : index
    %c0_17 = arith.constant 0 : index
    %18 = vector.load %arg5[%c0_16, %c6, %c0_17] : memref<1x10x64xf32, #tpu.memory_space<vmem>>, vector<1x1x64xf32>
    %19 = vector.shape_cast %18 : vector<1x1x64xf32> to vector<1x64xf32>
    %c0_18 = arith.constant 0 : index
    %c7 = arith.constant 7 : index
    %c0_19 = arith.constant 0 : index
    %20 = vector.load %arg5[%c0_18, %c7, %c0_19] : memref<1x10x64xf32, #tpu.memory_space<vmem>>, vector<1x1x32xf32>
    %21 = vector.shape_cast %20 : vector<1x1x32xf32> to vector<1x32xf32>
    %c0_20 = arith.constant 0 : index
    %c8 = arith.constant 8 : index
    %c0_21 = arith.constant 0 : index
    %22 = vector.load %arg5[%c0_20, %c8, %c0_21] : memref<1x10x64xf32, #tpu.memory_space<vmem>>, vector<1x1x32xf32>
    %23 = vector.shape_cast %22 : vector<1x1x32xf32> to vector<1x32xf32>
    %c0_22 = arith.constant 0 : index
    %c9 = arith.constant 9 : index
    %c0_23 = arith.constant 0 : index
    %24 = vector.load %arg5[%c0_22, %c9, %c0_23] : memref<1x10x64xf32, #tpu.memory_space<vmem>>, vector<1x1x32xf32>
    %25 = vector.shape_cast %24 : vector<1x1x32xf32> to vector<1x32xf32>
    %c0_24 = arith.constant 0 : index
    %c0_25 = arith.constant 0 : index
    %c0_26 = arith.constant 0 : index
    %c0_27 = arith.constant 0 : index
    %26 = vector.load %arg4[%c0_24, %c0_25, %c0_26, %c0_27] : memref<1x3x32x32xbf16, #tpu.memory_space<vmem>>, vector<1x1x32x32xbf16>
    %27 = vector.shape_cast %26 : vector<1x1x32x32xbf16> to vector<32x32xbf16>
    %cst = arith.constant dense<0.000000e+00> : vector<8x32xf32>
    %28 = tpu.matmul %5, %27, %cst {dimension_numbers = #tpu.dot_dimension_numbers<[1], [0], [0], [1], [0, 0, 1, 1], [], []>} : vector<8x32xbf16>, vector<32x32xbf16>, vector<8x32xf32> -> vector<8x32xf32>
    %29 = vector.broadcast %7 : vector<1x32xf32> to vector<8x32xf32>
    %30 = arith.addf %28, %29 : vector<8x32xf32>
    %c0_28 = arith.constant 0 : index
    %c1_29 = arith.constant 1 : index
    %c0_30 = arith.constant 0 : index
    %c0_31 = arith.constant 0 : index
    %31 = vector.load %arg4[%c0_28, %c1_29, %c0_30, %c0_31] : memref<1x3x32x32xbf16, #tpu.memory_space<vmem>>, vector<1x1x32x32xbf16>
    %32 = vector.shape_cast %31 : vector<1x1x32x32xbf16> to vector<32x32xbf16>
    %cst_32 = arith.constant dense<0.000000e+00> : vector<8x32xf32>
    %33 = tpu.matmul %5, %32, %cst_32 {dimension_numbers = #tpu.dot_dimension_numbers<[1], [0], [0], [1], [0, 0, 1, 1], [], []>} : vector<8x32xbf16>, vector<32x32xbf16>, vector<8x32xf32> -> vector<8x32xf32>
    %34 = vector.broadcast %9 : vector<1x32xf32> to vector<8x32xf32>
    %35 = arith.addf %33, %34 : vector<8x32xf32>
    %c0_33 = arith.constant 0 : index
    %c2_34 = arith.constant 2 : index
    %c0_35 = arith.constant 0 : index
    %c0_36 = arith.constant 0 : index
    %36 = vector.load %arg4[%c0_33, %c2_34, %c0_35, %c0_36] : memref<1x3x32x32xbf16, #tpu.memory_space<vmem>>, vector<1x1x32x32xbf16>
    %37 = vector.shape_cast %36 : vector<1x1x32x32xbf16> to vector<32x32xbf16>
    %cst_37 = arith.constant dense<0.000000e+00> : vector<8x32xf32>
    %38 = tpu.matmul %5, %37, %cst_37 {dimension_numbers = #tpu.dot_dimension_numbers<[1], [0], [0], [1], [0, 0, 1, 1], [], []>} : vector<8x32xbf16>, vector<32x32xbf16>, vector<8x32xf32> -> vector<8x32xf32>
    %39 = vector.broadcast %11 : vector<1x32xf32> to vector<8x32xf32>
    %40 = arith.addf %38, %39 : vector<8x32xf32>
    %41 = vector.shape_cast %30 : vector<8x32xf32> to vector<8x4x8xf32>
    %42 = vector.shape_cast %35 : vector<8x32xf32> to vector<8x4x8xf32>
    %43 = vector.shape_cast %40 : vector<8x32xf32> to vector<8x4x8xf32>
    "tpu.trace_start"() <{level = 10 : i32, message = "qhd,khd->hqk"}> : () -> ()
    %cst_38 = arith.constant dense<0.000000e+00> : vector<4x8x8xf32>
    %44 = tpu.matmul %41, %42, %cst_38 {dimension_numbers = #tpu.dot_dimension_numbers<[2], [2], [0], [0], [0, 1, 0, 0, 1, 0], [1], [1]>} : vector<8x4x8xf32>, vector<8x4x8xf32>, vector<4x8x8xf32> -> vector<4x8x8xf32>
    "tpu.trace_stop"() : () -> ()
    %cst_39 = arith.constant 0.353553385 : f32
    %45 = vector.broadcast %cst_39 : f32 to vector<4x8x8xf32>
    %46 = arith.mulf %44, %45 : vector<4x8x8xf32>
    %c0_40 = arith.constant 0 : index
    %c0_41 = arith.constant 0 : index
    %c0_42 = arith.constant 0 : index
    %47 = vector.load %arg3[%c0_40, %c0_41, %c0_42] : memref<1x1x8xf32, #tpu.memory_space<vmem>>, vector<1x1x8xf32>
    %48 = vector.shape_cast %47 : vector<1x1x8xf32> to vector<1x8xf32>
    %49 = vector.shape_cast %48 : vector<1x8xf32> to vector<1x1x8xf32>
    %50 = vector.broadcast %49 : vector<1x1x8xf32> to vector<4x8x8xf32>
    %51 = arith.addf %46, %50 : vector<4x8x8xf32>
    %cst_43 = arith.constant dense<0xFF800000> : vector<4x8xf32>
    %52 = vector.multi_reduction <maximumf>, %51, %cst_43 [2] : vector<4x8x8xf32> to vector<4x8xf32>
    %53 = vector.shape_cast %52 : vector<4x8xf32> to vector<4x8x1xf32>
    %54 = vector.broadcast %53 : vector<4x8x1xf32> to vector<4x8x8xf32>
    %55 = arith.subf %51, %54 : vector<4x8x8xf32>
    %56 = math.exp %55 : vector<4x8x8xf32>
    %cst_44 = arith.constant dense<0.000000e+00> : vector<4x8xf32>
    %57 = vector.multi_reduction <add>, %56, %cst_44 [2] : vector<4x8x8xf32> to vector<4x8xf32>
    %58 = vector.shape_cast %57 : vector<4x8xf32> to vector<4x8x1xf32>
    %59 = tpu.reciprocal %58 {approx = true} : vector<4x8x1xf32> -> vector<4x8x1xf32>
    %60 = arith.mulf %58, %59 : vector<4x8x1xf32>
    %cst_45 = arith.constant 2.000000e+00 : f32
    %61 = vector.broadcast %cst_45 : f32 to vector<4x8x1xf32>
    %62 = arith.subf %61, %60 : vector<4x8x1xf32>
    %63 = arith.mulf %59, %62 : vector<4x8x1xf32>
    %64 = vector.broadcast %63 : vector<4x8x1xf32> to vector<4x8x8xf32>
    %65 = arith.mulf %56, %64 : vector<4x8x8xf32>
    "tpu.trace_start"() <{level = 10 : i32, message = "hqk,khd->hqd"}> : () -> ()
    %cst_46 = arith.constant dense<0.000000e+00> : vector<4x8x8xf32>
    %66 = tpu.matmul %65, %43, %cst_46 {dimension_numbers = #tpu.dot_dimension_numbers<[2], [0], [1], [2], [0, 0, 0, 1, 1, 2], [0], [1]>} : vector<4x8x8xf32>, vector<8x4x8xf32>, vector<4x8x8xf32> -> vector<4x8x8xf32>
    "tpu.trace_stop"() : () -> ()
    %67 = tpu.transpose %66, [1, 0, 2] : vector<4x8x8xf32> -> vector<8x4x8xf32>
    %68 = vector.shape_cast %67 : vector<8x4x8xf32> to vector<8x32xf32>
    %69 = arith.truncf %68 : vector<8x32xf32> to vector<8x32xbf16>
    %c0_47 = arith.constant 0 : index
    %c0_48 = arith.constant 0 : index
    %c0_49 = arith.constant 0 : index
    %70 = vector.load %arg6[%c0_47, %c0_48, %c0_49] : memref<1x32x32xbf16, #tpu.memory_space<vmem>>, vector<1x32x32xbf16>
    %71 = vector.shape_cast %70 : vector<1x32x32xbf16> to vector<32x32xbf16>
    %cst_50 = arith.constant dense<0.000000e+00> : vector<8x32xf32>
    %72 = tpu.matmul %69, %71, %cst_50 {dimension_numbers = #tpu.dot_dimension_numbers<[1], [0], [0], [1], [0, 0, 1, 1], [], []>} : vector<8x32xbf16>, vector<32x32xbf16>, vector<8x32xf32> -> vector<8x32xf32>
    %73 = vector.broadcast %13 : vector<1x32xf32> to vector<8x32xf32>
    %74 = arith.addf %72, %73 : vector<8x32xf32>
    %75 = arith.addf %74, %4 : vector<8x32xf32>
    %cst_51 = arith.constant dense<0.000000e+00> : vector<8xf32>
    %76 = vector.multi_reduction <add>, %75, %cst_51 [1] : vector<8x32xf32> to vector<8xf32>
    %77 = vector.shape_cast %76 : vector<8xf32> to vector<8x1xf32>
    %cst_52 = arith.constant 3.200000e+01 : f32
    %78 = vector.broadcast %cst_52 : f32 to vector<8x1xf32>
    %79 = arith.divf %77, %78 : vector<8x1xf32>
    %80 = vector.broadcast %79 : vector<8x1xf32> to vector<8x32xf32>
    %81 = arith.subf %75, %80 : vector<8x32xf32>
    %82 = arith.mulf %81, %81 : vector<8x32xf32>
    %cst_53 = arith.constant dense<0.000000e+00> : vector<8xf32>
    %83 = vector.multi_reduction <add>, %82, %cst_53 [1] : vector<8x32xf32> to vector<8xf32>
    %84 = vector.shape_cast %83 : vector<8xf32> to vector<8x1xf32>
    %cst_54 = arith.constant 3.200000e+01 : f32
    %85 = vector.broadcast %cst_54 : f32 to vector<8x1xf32>
    %86 = arith.divf %84, %85 : vector<8x1xf32>
    %cst_55 = arith.constant 9.99999996E-13 : f32
    %87 = vector.broadcast %cst_55 : f32 to vector<8x1xf32>
    %88 = arith.addf %86, %87 : vector<8x1xf32>
    %89 = math.rsqrt %88 : vector<8x1xf32>
    %90 = vector.broadcast %89 : vector<8x1xf32> to vector<8x32xf32>
    %91 = arith.mulf %81, %90 : vector<8x32xf32>
    %92 = vector.broadcast %15 : vector<1x32xf32> to vector<8x32xf32>
    %93 = arith.mulf %91, %92 : vector<8x32xf32>
    %94 = vector.broadcast %17 : vector<1x32xf32> to vector<8x32xf32>
    %95 = arith.addf %93, %94 : vector<8x32xf32>
    %96 = arith.truncf %95 : vector<8x32xf32> to vector<8x32xbf16>
    %c0_56 = arith.constant 0 : index
    %c0_57 = arith.constant 0 : index
    %c0_58 = arith.constant 0 : index
    %97 = vector.load %arg7[%c0_56, %c0_57, %c0_58] : memref<1x32x64xbf16, #tpu.memory_space<vmem>>, vector<1x32x64xbf16>
    %98 = vector.shape_cast %97 : vector<1x32x64xbf16> to vector<32x64xbf16>
    %cst_59 = arith.constant dense<0.000000e+00> : vector<8x64xf32>
    %99 = tpu.matmul %96, %98, %cst_59 {dimension_numbers = #tpu.dot_dimension_numbers<[1], [0], [0], [1], [0, 0, 1, 1], [], []>} : vector<8x32xbf16>, vector<32x64xbf16>, vector<8x64xf32> -> vector<8x64xf32>
    %100 = vector.broadcast %19 : vector<1x64xf32> to vector<8x64xf32>
    %101 = arith.addf %99, %100 : vector<8x64xf32>
    %cst_60 = arith.constant 0.000000e+00 : f32
    %102 = vector.broadcast %cst_60 : f32 to vector<8x64xf32>
    %103 = arith.maximumf %101, %102 : vector<8x64xf32>
    %104 = arith.truncf %103 : vector<8x64xf32> to vector<8x64xbf16>
    %c0_61 = arith.constant 0 : index
    %c0_62 = arith.constant 0 : index
    %c0_63 = arith.constant 0 : index
    %105 = vector.load %arg8[%c0_61, %c0_62, %c0_63] : memref<1x64x32xbf16, #tpu.memory_space<vmem>>, vector<1x64x32xbf16>
    %106 = vector.shape_cast %105 : vector<1x64x32xbf16> to vector<64x32xbf16>
    %cst_64 = arith.constant dense<0.000000e+00> : vector<8x32xf32>
    %107 = tpu.matmul %104, %106, %cst_64 {dimension_numbers = #tpu.dot_dimension_numbers<[1], [0], [0], [1], [0, 0, 1, 1], [], []>} : vector<8x64xbf16>, vector<64x32xbf16>, vector<8x32xf32> -> vector<8x32xf32>
    %108 = vector.broadcast %21 : vector<1x32xf32> to vector<8x32xf32>
    %109 = arith.addf %107, %108 : vector<8x32xf32>
    %110 = arith.addf %109, %95 : vector<8x32xf32>
    %cst_65 = arith.constant dense<0.000000e+00> : vector<8xf32>
    %111 = vector.multi_reduction <add>, %110, %cst_65 [1] : vector<8x32xf32> to vector<8xf32>
    %112 = vector.shape_cast %111 : vector<8xf32> to vector<8x1xf32>
    %cst_66 = arith.constant 3.200000e+01 : f32
    %113 = vector.broadcast %cst_66 : f32 to vector<8x1xf32>
    %114 = arith.divf %112, %113 : vector<8x1xf32>
    %115 = vector.broadcast %114 : vector<8x1xf32> to vector<8x32xf32>
    %116 = arith.subf %110, %115 : vector<8x32xf32>
    %117 = arith.mulf %116, %116 : vector<8x32xf32>
    %cst_67 = arith.constant dense<0.000000e+00> : vector<8xf32>
    %118 = vector.multi_reduction <add>, %117, %cst_67 [1] : vector<8x32xf32> to vector<8xf32>
    %119 = vector.shape_cast %118 : vector<8xf32> to vector<8x1xf32>
    %cst_68 = arith.constant 3.200000e+01 : f32
    %120 = vector.broadcast %cst_68 : f32 to vector<8x1xf32>
    %121 = arith.divf %119, %120 : vector<8x1xf32>
    %cst_69 = arith.constant 9.99999996E-13 : f32
    %122 = vector.broadcast %cst_69 : f32 to vector<8x1xf32>
    %123 = arith.addf %121, %122 : vector<8x1xf32>
    %124 = math.rsqrt %123 : vector<8x1xf32>
    %125 = vector.broadcast %124 : vector<8x1xf32> to vector<8x32xf32>
    %126 = arith.mulf %116, %125 : vector<8x32xf32>
    %127 = vector.broadcast %23 : vector<1x32xf32> to vector<8x32xf32>
    %128 = arith.mulf %126, %127 : vector<8x32xf32>
    %129 = vector.broadcast %25 : vector<1x32xf32> to vector<8x32xf32>
    %130 = arith.addf %128, %129 : vector<8x32xf32>
    %c0_70 = arith.constant 0 : index
    %c0_71 = arith.constant 0 : index
    %c0_72 = arith.constant 0 : index
    %131 = vector.load %arg9[%c0_70, %c0_71, %c0_72] : memref<1x8x32xf32, #tpu.memory_space<vmem>>, vector<1x8x32xf32>
    %132 = vector.shape_cast %131 : vector<1x8x32xf32> to vector<8x32xf32>
    %133 = vector.shape_cast %130 : vector<8x32xf32> to vector<1x8x32xf32>
    tpu.vector_store %arg9[%c0_70, %c0_71, %c0_72], %133 {strides = array<i32>} : memref<1x8x32xf32, #tpu.memory_space<vmem>>, vector<1x8x32xf32>,
    return
  }
  func.func @transform_0(%arg0: i32, %arg1: i32) -> (i32, i32, i32) {
    %c0_i32 = arith.constant 0 : i32
    %c0_i32_0 = arith.constant 0 : i32
    %c0_i32_1 = arith.constant 0 : i32
    return %arg0, %c0_i32, %c0_i32_0 : i32, i32, i32
  }
  func.func @transform_1(%arg0: i32, %arg1: i32) -> (i32, i32, i32) {
    %c0_i32 = arith.constant 0 : i32
    %c0_i32_0 = arith.constant 0 : i32
    %c0_i32_1 = arith.constant 0 : i32
    return %arg0, %c0_i32, %c0_i32_0 : i32, i32, i32
  }
  func.func @transform_2(%arg0: i32, %arg1: i32) -> (i32, i32, i32, i32) {
    %c0_i32 = arith.constant 0 : i32
    %c0_i32_0 = arith.constant 0 : i32
    %c0_i32_1 = arith.constant 0 : i32
    %c0_i32_2 = arith.constant 0 : i32
    return %arg1, %c0_i32, %c0_i32_0, %c0_i32_1 : i32, i32, i32, i32
  }
  func.func @transform_3(%arg0: i32, %arg1: i32) -> (i32, i32, i32) {
    %c0_i32 = arith.constant 0 : i32
    %c0_i32_0 = arith.constant 0 : i32
    %c0_i32_1 = arith.constant 0 : i32
    return %arg1, %c0_i32, %c0_i32_0 : i32, i32, i32
  }
  func.func @transform_4(%arg0: i32, %arg1: i32) -> (i32, i32, i32) {
    %c0_i32 = arith.constant 0 : i32
    %c0_i32_0 = arith.constant 0 : i32
    %c0_i32_1 = arith.constant 0 : i32
    return %arg1, %c0_i32, %c0_i32_0 : i32, i32, i32
  }
  func.func @transform_5(%arg0: i32, %arg1: i32) -> (i32, i32, i32) {
    %c0_i32 = arith.constant 0 : i32
    %c0_i32_0 = arith.constant 0 : i32
    %c0_i32_1 = arith.constant 0 : i32
    return %arg1, %c0_i32, %c0_i32_0 : i32, i32, i32
  }
  func.func @transform_6(%arg0: i32, %arg1: i32) -> (i32, i32, i32) {
    %c0_i32 = arith.constant 0 : i32
    %c0_i32_0 = arith.constant 0 : i32
    %c0_i32_1 = arith.constant 0 : i32
    return %arg1, %c0_i32, %c0_i32_0 : i32, i32, i32
  }
  func.func @transform_7(%arg0: i32, %arg1: i32) -> (i32, i32, i32) {
    %c0_i32 = arith.constant 0 : i32
    %c0_i32_0 = arith.constant 0 : i32
    %c0_i32_1 = arith.constant 0 : i32
    return %arg0, %c0_i32, %c0_i32_0 : i32, i32, i32
  }
}

</mosaic_0001>

<bundles_post_ra>
// kernel: tpu_custom_call.1
= control target key start
LH: loop header
LB: loop body
LE: loop exit
PB: predicated region body
PF: predicated region fallthrough
CT: control target
= control target key end

     0   :  { %s3091_s0 = inlined_call_operand.hbm [shape: f32[2,8,32], index: 0, kind: input, shape index: {}]   ;;  %s3092_s1 = inlined_call_operand.vmem [shape: f32[2,1,8], index: 1, kind: input, shape index: {}]   ;;  %s3093_s2 = inlined_call_operand.vmem [shape: bf16[2,3,32,32], index: 2, kind: input, shape index: {}]   ;;  %s3094_s3 = inlined_call_operand.vmem [shape: f32[2,10,64], index: 3, kind: input, shape index: {}]   ;;  %s3095_s4 = inlined_call_operand.vmem [shape: bf16[2,32,32], index: 4, kind: input, shape index: {}]   ;;  %s3096_s5 = inlined_call_operand.hbm [shape: bf16[2,32,64], index: 5, kind: input, shape index: {}]   ;;  %s3097_s6 = inlined_call_operand.vmem [shape: bf16[2,64,32], index: 6, kind: input, shape index: {}]   ;;  %s3098_s7 = inlined_call_operand.hbm [shape: f32[2,8,32], index: 7, kind: output, shape index: {}]  }
   0x1   :  { %3115 = sst [smem:[#allocation23_spill]] %s3091_s0 }
   0x2   :  { %3116 = sst [smem:[#allocation24_spill]] %s3096_s5 }
   0x3   :  { %3117 = sst [smem:[#allocation25_spill]] %s3098_s7 }
   0x4   :  { %12 = vsyncpa [#allocation3], 0 }
   0x5   :  { %14 = vsyncpa [#allocation3 + $0x1], 0 }
   0x6   :  { %15 = vsyncpa [#allocation6], 0 }
   0x7   :  { %17 = vsyncpa [#allocation6 + $0x1], 0 }
   0x8   :  { %18 = vsyncpa [#allocation4], 0 }
   0x9   :  { %20 = vsyncpa [#allocation4 + $0x1], 0  ;;  %s2644_s24 = smov 0   ;;  %s2646_s25 = smov 0  }
   0xa   :  { %s2648_s26 = smov 0   ;;  %s2650_s27 = smov 0  }
   0xb   :  { %s2652_s28 = smov 0   ;;  %s2654_s29 = smov 0  }
   0xc   :  { %s2656_s30 = smov 0   ;;  %s2658_s8 = smov 0  }
   0xd   :  { %s2660_s9 = smov 0   ;;  %s2662_s10 = smov 0  }
   0xe   :  { %s2664_s11 = smov 0  }
   0xf LB: > { %3118 = sst [smem:[#allocation11_spill]] %s2559_s27  ;;  %s2041_s12 = sadd.s32 4294967295, %s2587_s11   ;;  %s2587_s11 = sphi %s2664_s11, %s26_s11   ;;  %s2583_s10 = sphi %s2662_s10, %s3164_s10   ;;  %s2579_s9 = sphi %s2660_s9, %s3163_s9   ;;  %s2575_s8 = sphi %s2658_s8, %s3162_s8   ;;  %s2571_s30 = sphi %s2656_s30, %s3161_s30   ;;  %s2567_s29 = sphi %s2654_s29, %s3160_s29   ;;  %s2563_s28 = sphi %s2652_s28, %s3159_s28   ;;  %s2559_s27 = sphi %s2650_s27, %s3158_s27   ;;  %s2555_s26 = sphi %s2648_s26, %s3167_s26   ;;  %s2551_s25 = sphi %s2646_s25, %s3166_s25   ;;  %s2547_s24 = sphi %s2644_s24, %s3165_s24  }
  0x10   : > { %3119 = sst [smem:[#allocation12_spill]] %s2563_s28  ;;  %s2042_s13 = sadd.s32 4294967294, %s2587_s11  }
  0x11   : > { %3120 = sst [smem:[#allocation13_spill]] %s2567_s29  ;;  %p52_p0 = scmp.ne.s32.totalorder %s2567_s29, %s2563_s28 }
  0x12   : > { %3121 = sst [smem:[#allocation14_spill]] %s2579_s9  ;;  %p53_p1 = scmp.eq.s32.totalorder %s2587_s11, 0 }
  0x13   : > { %3122 = sst [smem:[#allocation15_spill]] %s2583_s10  ;;  %p58_p2 = scmp.ne.s32.totalorder %s2563_s28, %s2559_s27 }
  0x14   : > { %3123 = sst [smem:[#allocation16_spill]] %s2587_s11  ;;  %p59_p3 = scmp.eq.s32.totalorder %s2041_s12, 0 }
  0x15   : > { %p2706_p4 = por %p53_p1, %p52_p0  ;;  %p182_p5 = scmp.ne.s32.totalorder %s2555_s26, %s2551_s25 }
  0x16   : > { %p2712_p6 = por %p59_p3, %p58_p2  ;;  %p188_p7 = scmp.ne.s32.totalorder %s2551_s25, %s2547_s24 }
  0x17   : > { %p2717_p8 = por %p182_p5, %p53_p1  ;;  %p238_p9 = scmp.eq.s32.totalorder %s2041_s12, 3 }
  0x18   : > { %s3125_s17 = scalar_select %p2712_p6, 1, 0 }
  0x19   : > { %p2721_p10 = por %p188_p7, %p59_p3  ;;  %p244_p11 = scmp.eq.s32.totalorder %s2042_s13, 3 }
  0x1a   : > { %p2725_p12 = por %p238_p9, %p52_p0  ;;  %p2265_p1 = scmp.lt.s32.totalorder %s2587_s11, 4 }
  0x1b   : > { %s3127_s19 = scalar_select %p2721_p10, 1, 0 }
  0x1c   : > { %s3128_s20 = scalar_select %p2725_p12, 1, 0 }
  0x1d   : > { %p2729_p13 = por %p244_p11, %p58_p2  ;;  %s264_s22 = sand.u32 1, %s2567_s29  }
  0x1e   : > { %3129 = sst [smem:[#allocation17_spill]] %s3128_s20  ;;  %s2046_s23 = sshll.u32 %s2583_s10, 7 }
  0x1f   : > { %s3130_s21 = scalar_select %p2729_p13, 1, 0 }
  0x20   : > { %s2045_s24 = sshll.u32 %s264_s22, 3  ;;  %s3132_s0 = sld [smem:[#allocation23_spill]] }
  0x21   : > { %3131 = sst [smem:[#allocation18_spill]] %s3130_s21  ;;  %s268_s13 = scalar_lea.vmem [#allocation2], %s2045_s24 }
  0x22   : > { %s275_s27 = sshll.u32 %s268_s13, 4  ;;  %p2743_p0 = pnand %p2265_p1, %p2706_p4  ;;  %s2747_s27 = int_to_ptr.vmem [resolvable:$true] %s275_s27 }
  0x23   : > { %p2751_p2 = pnand %p2265_p1, %p2717_p8  ;;  %s265_s15 = scalar_lea.sflag [#allocation3], %s264_s22 }
  0x24   : > { %p2403_p7 = pneg %p2743_p0 }
  0x26   : > { %s2739_s12 = scalar_lea.hbm %s3132_s0, %s2046_s23  ;;  %s2406_s13 = scalar_lea.hbm %s3132_s0, 256 }
  0x27   : > { %s2401_s23 = scalar_lea.hbm %s2739_s12, 128  ;;  %p2407_p8 = scmp.lt.u32.totalorder %s2739_s12, %s3132_s0 }
  0x28   : > { %p2402_p5 = scmp.ne.s32.totalorder %s2739_s12, %s2401_s23  ;;  %p2408_p11 = scmp.lt.u32.totalorder %s2406_s13, %s2401_s23 }
  0x29   : > { %p2410_p3 = scmp.lt.u32.totalorder %s2401_s23, %s2739_s12 }
  0x2a   : > { %p2404_p4 = pnand %p2403_p7, %p2402_p5  ;;  %p2409_p1 = por %p2408_p11, %p2407_p8 }
  0x2c   : > { %p2405_p9 = pneg %p2404_p4  ;;  %p2411_p13 = por %p2410_p3, %p2409_p1 }
  0x2e   : > { %p2412_p12 = pnand %p2411_p13, %p2405_p9 }
  0x30   : > { %2415 = shalt.err (!%p2412_p12)
}
  0x31   : > { %s2416_s22 = scalar_lea.vmem %s2747_s27, 128  ;;  %s2589_s16 = smov [#allocation2]  }
  0x32   : > { %p2417_p5 = scmp.ne.s32.totalorder %s2747_s27, %s2416_s22  ;;  %s2421_s24 = sshll.u32 %s2589_s16, 4  ;;  %s2422_s24 = int_to_ptr.vmem [resolvable:$false] %s2421_s24 }
  0x33   : > { %s2423_s21 = scalar_lea.vmem %s2422_s24, 256  ;;  %p2424_p6 = scmp.lt.s32.totalorder %s2747_s27, %s2422_s24 }
  0x34   : > { %p2419_p4 = pnand %p2417_p5, %p2403_p7  ;;  %p2425_p8 = scmp.lt.s32.totalorder %s2423_s21, %s2416_s22 }
  0x36   : > { %p2420_p10 = pneg %p2419_p4  ;;  %p2426_p11 = por %p2425_p8, %p2424_p6 }
  0x38   : > { %p2427_p3 = pnand %p2426_p11, %p2420_p10 }
  0x3a   : > { %2430 = shalt.err (!%p2427_p3)
}
  0x3b   : > { %2257 = dma.hbm_to_vmem [thread:$0]  (!%p2743_p0), %s2739_s12, 128, %s2747_s27, %s265_s15  }
  0x3c   : > { %p339_p12 = scmp.lt.s32.totalorder %s2587_s11, 5  ;;  %s175_s23 = sadd.s32 1, %s2555_s26 }
  0x3d   : > { %p3135_p13 = scmp.ge.s32.totalorder %s2587_s11, 1  ;;  %s35_s7 = sadd.s32 1, %s2579_s9 }
  0x3e   : > { %s312_s18 = sand.u32 1, %s2555_s26   ;;  %p36_p10 = scmp.ge.s32.totalorder %s35_s7, 2 }
  0x3f   : > { %p2785_p6 = pnand %p3135_p13, %p339_p12  ;;  %s2047_s22 = sshll.u32 %s312_s18, 4 }
  0x40   : > { %s2115_s16 = sshll.u32 %s2579_s9, 8  ;;  %s3169_s7 = smov (%p36_p10, %s35_s7), 0 }
  0x41   : > { %3137 = sst [smem:[#allocation19_spill]] %s3169_s7  ;;  %s3138_s24 = sadd.s32 1, %s2583_s10 }
  0x42   : > { %s3171_s24 = smov (!%p36_p10, %s3138_s24), %s2583_s10  ;;  %s172_s27 = ssub.s32 %s2579_s9, %s3169_s7 }
  0x43   : > { %p40_p0 = scmp.ge.s32.totalorder %s3171_s24, 2  ;;  %p173_p7 = scmp.eq.s32.totalorder %s172_s27, 0 }
  0x44   : > { %s3139_s5 = sld [smem:[#allocation24_spill]]  ;;  %s316_s0 = scalar_lea.vmem [#allocation5], %s2047_s22 }
  0x45   : > { %s323_s11 = sshll.u32 %s316_s0, 4  ;;  %s3173_s24 = smov (%p40_p0, %s3171_s24), 0  ;;  %s2811_s11 = int_to_ptr.vmem [resolvable:$true] %s323_s11 }
  0x46   : > { %3140 = sst [smem:[#allocation20_spill]] %s3173_s24  ;;  %s42_s7 = ssub.s32 %s2583_s10, %s3173_s24 }
  0x47   : > { %s2807_s20 = scalar_select %p173_p7, %s2555_s26, %s175_s23  }
  0x48   : > { %p43_p9 = scmp.eq.s32.totalorder %s42_s7, 0  ;;  %s3142_s27 = sadd.s32 1, %s2567_s29 }
  0x49   : > { %3141 = sst [smem:[#allocation21_spill]] %s2807_s20  ;;  %p2433_p5 = pneg %p2751_p2 }
  0x4a   : > { %s2802_s21 = scalar_lea.hbm %s3139_s5, %s2115_s16  ;;  %s2818_s16 = scalar_lea.sflag [#allocation6], %s312_s18 }
  0x4b   : > { %s2816_s9 = scalar_select %p43_p9, %s2567_s29, %s3142_s27  }
  0x4c   : > { %s2431_s12 = scalar_lea.hbm %s2802_s21, 256  ;;  %s2436_s22 = scalar_lea.hbm %s3139_s5, 512 }
  0x4d   : > { %3143 = sst [smem:[#allocation22_spill]] %s2816_s9  ;;  %p2432_p1 = scmp.ne.s32.totalorder %s2802_s21, %s2431_s12 }
  0x4e   : > { %p2437_p11 = scmp.lt.u32.totalorder %s2802_s21, %s3139_s5  ;;  %p2438_p3 = scmp.lt.u32.totalorder %s2436_s22, %s2431_s12 }
  0x4f   : > { %p2434_p4 = pnand %p2433_p5, %p2432_p1  ;;  %p2440_p13 = scmp.lt.u32.totalorder %s2431_s12, %s2802_s21 }
  0x50   : > { %p2439_p12 = por %p2438_p3, %p2437_p11 }
  0x51   : > { %p2435_p8 = pneg %p2434_p4 }
  0x52   : > { %p2441_p10 = por %p2440_p13, %p2439_p12 }
  0x54   : > { %p2442_p0 = pnand %p2441_p10, %p2435_p8 }
  0x56   : > { %2445 = shalt.err (!%p2442_p0)
}
  0x57   : > { %s2446_s7 = scalar_lea.vmem %s2811_s11, 256  ;;  %s2590_s18 = smov [#allocation5]  }
  0x58   : > { %p2447_p7 = scmp.ne.s32.totalorder %s2811_s11, %s2446_s7  ;;  %s2451_s27 = sshll.u32 %s2590_s18, 4  ;;  %s2452_s27 = int_to_ptr.vmem [resolvable:$false] %s2451_s27 }
  0x59   : > { %s2453_s24 = scalar_lea.vmem %s2452_s27, 512  ;;  %p2454_p4 = scmp.lt.s32.totalorder %s2811_s11, %s2452_s27 }
  0x5a   : > { %p2449_p9 = pnand %p2447_p7, %p2433_p5  ;;  %p2455_p11 = scmp.lt.s32.totalorder %s2453_s24, %s2446_s7 }
  0x5c   : > { %p2450_p1 = pneg %p2449_p9  ;;  %p2456_p3 = por %p2455_p11, %p2454_p4 }
  0x5e   : > { %p2457_p12 = pnand %p2456_p3, %p2450_p1 }
  0x60   : > { %2460 = shalt.err (!%p2457_p12)
}
  0x61   : > { %s2591_s12 = smov 64   ;;  %s2592_s0 = smov 4  }
  0x62   : > { %2260 = dma.hbm_to_vmem [thread:$0]  (!%p2751_p2), %s2802_s21, 256, %s2811_s11, %s2818_s16, %s2591_s12, %s2591_s12, %s2592_s0  }
  0x63   : > { %343 = sbr.rel (%p2785_p6) target bundleno = 2785 (0xae1), region = 48  ;;  %s2849_s23 = sand.u32 (!%p2785_p6), 1, %s2563_s28  }
  0x64   : > { %s2051_s22 = sshll.u32 (!%p2785_p6), %s2849_s23, 3  ;;  %s346_s15 = scalar_lea.sflag (!%p2785_p6), [#allocation3], %s2849_s23 }
  0x65   : > { %s349_s7 = scalar_lea.vmem (!%p2785_p6), [#allocation2], %s2051_s22  ;;  %p3144_p5 = scmp.ne.s32.totalorder (!%p2785_p6), %s3125_s17, 0 }
  0x6a   : > { %2534 = dma.done.wait (%p3144_p5), %s346_s15, 128  }
  0x6b   : > { %2536 = vsyncadd (%p3144_p5), %s346_s15, 4294967168  ;;  %s354_s11 = sand.u32 1, %s2551_s25   ;;  %p3145_p2 = scmp.ne.s32.totalorder %s3127_s19, 0 }
  0x6c   : > { %s2858_s14 = sshll.u32 %s354_s11, 4  ;;  %s355_s13 = scalar_lea.sflag [#allocation6], %s354_s11 }
  0x6d   : > { %2538 = dma.done.wait (%p3145_p2), %s355_s13, 256  }
  0x6e   : > { %2540 = vsyncadd (%p3145_p2), %s355_s13, 4294967040  ;;  %p417_p6 = scmp.lt.s32.totalorder %s2575_s8, 1  ;;  %p420_p8 = scmp.lt.s32.totalorder %s2571_s30, 1 }
  0x6f   : > { %s2895_s20 = scalar_lea.vmem [#allocation7], %s2051_s22  ;;  %p2061_p13 = scmp.ne.s32.totalorder %s2571_s30, 0 }
  0x70   : > { %s2868_s17 = scalar_select %p417_p6, %s2575_s8, 1 }
  0x71   : > { %s421_s16 = scalar_select %p420_p8, %s2571_s30, 1 }
  0x72   : > { %444 = sbr.rel (%p2061_p13) target bundleno = 121 (0x79), region = 60  ;;  %v445_v0 = vld [vmem:[%s349_s7] sm:$0xff] (!%p2061_p13)  ;;  %vm446_vm0 = vcmask (!%p2061_p13), 261120  }
  0x73   : > { %s2247_s12 = smul.u32 48, %s421_s16  ;;  %s2116_s0 = sshll.u32 %s421_s16, 4  ;;  %447 = vst.msk [vmem:[%s2895_s20] sm:$0xff] (!%p2061_p13), %vm446_vm0, %v445_v0 }
  0x74   : > { %s2878_s19 = scalar_lea.vmem %s3094_s3, %s2116_s0  ;;  %s2883_s5 = scalar_lea.vmem %s3095_s4, %s2116_s0 }
  0x75   : > { %s2888_s29 = scalar_lea.vmem %s3093_s2, %s2247_s12  ;;  %s2118_s28 = sshll.u32 %s421_s16, 5 }
  0x76   : > { %s2893_s24 = scalar_lea.vmem %s3097_s6, %s2118_s28 }
  0x79 PF: > { %v2367_v1 = vld [vmem:[%s2888_s29] sm:$0xff]   ;;  %v2593_v2 = vmov 0.0   ;;  %v2368_v3 = vld [vmem:[%s2888_s29 + $0x8] sm:$0xff]   ;;  %vm2594_vm1 = vmmov 0   ;;  %vm480_vm2 = vcmask 261120   ;;  %v2369_v5 = vld [vmem:[%s2888_s29 + $0x10] sm:$0xff]   ;;  %s3146_s22 = scalar_lea.vmem %s3092_s1, %s2868_s17 }
  0x7a   : > { %2155 = vmatprep.subr.bf16.mxu1 %v2593_v2  ;;  %2171 = vmatprep.subr.bf16.mxu0 %v2593_v2  ;;  %v2906_v4 = vld [vmem:[%s2895_s20] sm:$0xff]  ;;  %v2070_v12 = vld [vmem:[%s2878_s19 + $0x1] ss:$0 sm:$0xff]  ;;  %v2062_v16 = vld [vmem:[%s2878_s19] ss:$0 sm:$0xff]  ;;  %s2595_s28 = smov 104  }
  0x7b   : > { %2156 = vmatpush3.bf16.msra.mxu1 %v2367_v1  ;;  %2159 = vmatprep.mubr.msk.bf16.mxu1 %vm2594_vm1, %v2593_v2  ;;  %v449_v6 = vpack.c.bf16 %v2906_v4, %v2906_v4  ;;  %v2370_v7 = vld [vmem:[%s2888_s29 + $0x18] sm:$0xff]   ;;  %s2596_s30 = smov 120   ;;  %s2597_s9 = smov 112   ;;  %v2371_v20 = vld [vmem:[%s2888_s29 + $0x20] sm:$0xff]   ;;  %v2372_v21 = vld [vmem:[%s2888_s29 + $0x28] sm:$0xff]   ;;  %vm801_vm3 = vcmask 64512  }
  0x7c   : > { %2157 = vmatprep.subr.bf16.mxu1 %v2593_v2  ;;  %2175 = vmatprep.mubr.msk.bf16.mxu0 %vm2594_vm1, %v2593_v2  ;;  %v2078_v32 = vld [vmem:[%s2878_s19 + $0x2] ss:$0 sm:$0xff]  ;;  %v2086_v39 = vld [vmem:[%s3146_s22] ss:$0 sm:$0xff]  ;;  %s2601_s7 = smov 8   ;;  %s2602_s21 = smov 24  }
  0x7d   : > { %2172 = vmatpush3.bf16.msra.mxu0 %v2371_v20  ;;  %vm1602_vm4 = vcmask 130048   ;;  %vm1604_vm5 = vcmask 195584   ;;  %s3147_s17 = scalar_lea.vmem [#allocation5], %s2858_s14  ;;  %vm1797_vm6 = vcmask 523264   ;;  %s3149_s14 = sld [smem:[#allocation17_spill]] }
  0x7e   : > { %2173 = vmatprep.subr.bf16.mxu0 %v2593_v2  ;;  %s3148_s16 = smov %s3147_s17  ;;  %s1880_s12 = sshll.u32 %s2895_s20, 4  ;;  %s3028_s12 = int_to_ptr.vmem [resolvable:$true] %s1880_s12 }
  0x7f   : > { %2158 = vmatpush3.bf16.msra.mxu1 %v2368_v3  ;;  %s3150_s11 = sld [smem:[#allocation25_spill]]  ;;  %s1867_s27 = scalar_lea.sflag [#allocation4], %s2849_s23 }
  0x80   : > { %2163 = vmatprep.subr.bf16.mxu1 %v2593_v2 }
  0x81   : > { %2174 = vmatpush3.bf16.msra.mxu0 %v2372_v21 }
  0x82   : > { %2160 = vmatmul.mubr.msk.bf16.vlgmr.msra.gmra.mrb[0].mxu1 %vm480_vm2, %v449_v6  ;;  %2189 = vmatprep.subr.mxu0 %v2593_v2 }
  0x83   : > { %2164 = vmatpush3.bf16.msra.mxu1 %v2369_v5  ;;  %2167 = vmatprep.mubr.msk.bf16.mxu1 %vm2594_vm1, %v2593_v2  ;;  %p3152_p0 = scmp.ne.s32.totalorder %s3149_s14, 0 }
  0x84   : > { %2165 = vmatprep.subr.bf16.mxu1 %v2593_v2  ;;  %2176 = vmatmul.mubr.msk.bf16.vlgmr.msra.gmra.mrb[0].mxu0 %vm480_vm2, %v449_v6 }
  0x85   : > { %2191 = vmatprep.mubr.msk.f32.mxu0 %vm2594_vm1, %v2593_v2  ;;  %s3151_s13 = smov %s3150_s11 }
  0x87   : > { %2166 = vmatpush3.bf16.msra.mxu1 %v2370_v7 }
  0x88   : > { %2179 = vmatprep.subr.mxu1 %v2593_v2 }
  0x8a   : > { %2168 = vmatmul.mubr.msk.bf16.vlgmr.msra.gmra.mrb[4].mxu1 %vm480_vm2, %v449_v6 }
  0x8b   : > { %2181 = vmatprep.mubr.msk.f32.mxu1 %vm2594_vm1, %v2593_v2 }
 0x155   : > { %v518_v8 = vpop.f32.mrb[0].mxu1 }
 0x156   : > { %v2161_v9 = vpop.f32.mrb[1].mxu1  ;;  %v519_v19 = vadd.f32 %v2062_v16, %v518_v8 }
 0x157   : > { %v521_v10 = vpop.f32.mrb[2].mxu1  ;;  %v640_v33 = vpop.f32.mrb[0].mxu0 }
 0x158   : > { %v2162_v11 = vpop.f32.mrb[3].mxu1  ;;  %v641_v34 = vadd.f32 %v2078_v32, %v640_v33  ;;  %v2177_v35 = vpop.f32.mrb[1].mxu0 }
 0x159   : > { %v643_v36 = vpop.f32.mrb[2].mxu0 }
 0x15a   : > { %v2178_v37 = vpop.f32.mrb[3].mxu0 }
 0x15d   : > { %v579_v13 = vpop.f32.mrb[4].mxu1 }
 0x15e   : > { %v580_v14 = vadd.f32 %v2070_v12, %v579_v13  ;;  %v2169_v15 = vpop.f32.mrb[5].mxu1 }
 0x15f   : > { %v582_v17 = vpop.f32.mrb[6].mxu1 }
 0x160   : > { %660 = vrot.lane.b32.xlu1 %v580_v14, %s2595_s28  ;;  %654 = vrot.lane.b32.xlu0 %v580_v14, %s2596_s30  ;;  %v2170_v18 = vpop.f32.mrb[7].mxu1 }
 0x164   : > { %647 = vrot.lane.b32.xlu1 %v519_v19, %s2596_s30  ;;  %657 = vrot.lane.b32.xlu0 %v580_v14, %s2597_s9 }
 0x168   : > { %651 = vrot.lane.b32.xlu1 %v519_v19, %s2595_s28  ;;  %649 = vrot.lane.b32.xlu0 %v519_v19, %s2597_s9 }
 0x186   : > { %673 = vxpose.xlu0.b32.start.end [1/1] (short) (narrow) %v580_v14, 8 }
 0x1d2   : > { %v655_v22 = vpop.permute.xlu0 %654  ;;  %v661_v24 = vpop.permute.xlu1 %660 }
 0x1d3   : > { %705 = vxpose.xlu1.b32.start.end [1/1] (short) (narrow) %v655_v22, 8 }
 0x1d6   : > { %v658_v23 = vpop.permute.xlu0 %657  ;;  %v648_v27 = vpop.permute.xlu1 %647 }
 0x1d7   : > { %737 = vxpose.xlu0.b32.start.end [1/1] (short) (narrow) %v658_v23, 8 }
 0x1da   : > { %v650_v25 = vpop.permute.xlu0 %649  ;;  %v652_v28 = vpop.permute.xlu1 %651 }
 0x1db   : > { %769 = vxpose.xlu0.b32.start.end [1/1] (short) (narrow) %v661_v24, 8 }
 0x206   : > { %v689_v26 = vpop.trf.xlu0 }
 0x207   : > { %2180 = vmatpush3.msra.mxu1 %v689_v26 }
 0x208   : > { %2182 = vmatmul.mubr.msk.f32.vlgmr.msra.gmra.mrb[8].mxu1 %vm801_vm3, %v519_v19  ;;  %2184 = vmatprep.subr.mxu1 %v2593_v2 }
 0x209   : > { %2186 = vmatprep.mubr.msk.f32.mxu1 %vm2594_vm1, %v2593_v2 }
 0x253   : > { %v721_v29 = vpop.trf.xlu1 }
 0x254   : > { %2185 = vmatpush3.msra.mxu1 %v721_v29 }
 0x255   : > { %2187 = vmatmul.mubr.msk.f32.vlgmr.msra.gmra.mrb[10].mxu1 %vm801_vm3, %v648_v27  ;;  %2194 = vmatprep.subr.mxu1 %v2593_v2 }
 0x256   : > { %2196 = vmatprep.mubr.msk.f32.mxu1 %vm2594_vm1, %v2593_v2 }
 0x257   : > { %v753_v30 = vpop.trf.xlu0 }
 0x258   : > { %2190 = vmatpush3.msra.mxu0 %v753_v30 }
 0x259   : > { %2192 = vmatmul.mubr.msk.f32.vlgmr.msra.gmra.mrb[4].mxu0 %vm801_vm3, %v650_v25  ;;  %2199 = vmatprep.subr.mxu0 %v2593_v2 }
 0x25a   : > { %2201 = vmatprep.mubr.msk.f32.mxu0 %vm2594_vm1, %v2593_v2  ;;  %2200 = vmatpush3.msra.mxu0 %v641_v34 }
 0x25b   : > { %v785_v31 = vpop.trf.xlu0  ;;  %2209 = vmatprep.subr.mxu0 %v2593_v2 }
 0x25c   : > { %2195 = vmatpush3.msra.mxu1 %v785_v31 }
 0x25d   : > { %2197 = vmatmul.mubr.msk.f32.vlgmr.msra.gmra.mrb[12].mxu1 %vm801_vm3, %v652_v28  ;;  %2204 = vmatprep.subr.mxu1 %v2593_v2 }
 0x25e   : > { %2206 = vmatprep.mubr.msk.f32.mxu1 %vm2594_vm1, %v2593_v2 }
 0x2db   : > { %v870_v38 = vpop.f32.mrb[8].mxu1 }
 0x2dc   : > { %v1090_v40 = vmul.f32 0.35355338, %v870_v38  ;;  %v2183_v41 = vpop.f32.mrb[9].mxu1 }
 0x2de   : > { %v1101_v42 = vadd.f32 %v2086_v39, %v1090_v40 }
 0x2e0   : > { %v1105_v43 = vsel %vm801_vm3, %v1101_v42, -inf }
 0x2e1   : > { %1106 = vmax.xlane.f32.xlu0 %v1105_v43 }
 0x328   : > { %v942_v44 = vpop.f32.mrb[10].mxu1 }
 0x329   : > { %v1091_v45 = vmul.f32 0.35355338, %v942_v44  ;;  %v2188_v46 = vpop.f32.mrb[11].mxu1 }
 0x32a   : > { %v2598_v46 = vmov 1983009808  }
 0x32b   : > { %v1102_v47 = vadd.f32 %v2086_v39, %v1091_v45 }
 0x32c   : > { %v1014_v48 = vpop.f32.mrb[4].mxu0 }
 0x32d   : > { %v1092_v49 = vmul.f32 0.35355338, %v1014_v48  ;;  %v2193_v50 = vpop.f32.mrb[5].mxu0  ;;  %v1108_v51 = vsel %vm801_vm3, %v1102_v47, -inf  ;;  %v1458_v48 = vlaneseq }
 0x32e   : > { %1109 = vmax.xlane.f32.xlu1 %v1108_v51  ;;  %v2599_v51 = vmov 1934713408  }
 0x32f   : > { %v1103_v52 = vadd.f32 %v2086_v39, %v1092_v49 }
 0x330   : > { %v1086_v53 = vpop.f32.mrb[12].mxu1 }
 0x331   : > { %v1093_v54 = vmul.f32 0.35355338, %v1086_v53  ;;  %v2198_v55 = vpop.f32.mrb[13].mxu1  ;;  %v1111_v56 = vsel %vm801_vm3, %v1103_v52, -inf }
 0x332   : > { %1112 = vmax.xlane.f32.xlu1 %v1111_v56 }
 0x333   : > { %v1104_v57 = vadd.f32 %v2086_v39, %v1093_v54  ;;  %v1459_v54 = vshrl.u32 %v1458_v48, 7 }
 0x335   : > { %v1114_v58 = vsel %vm801_vm3, %v1104_v57, -inf }
 0x336   : > { %1115 = vmax.xlane.f32.xlu0 %v1114_v58 }
 0x36e   : > { %v1107_v59 = vpop.xlane.xlu0 %1106 }
 0x36f   : > { %v1117_v60 = vsub.f32 %v1101_v42, %v1107_v59 }
 0x371   : > { %v1121_v61 = vmul.f32 1.442695, %v1117_v60 }
 0x373   : > { %2381 = vpow2.f32 %v1121_v61 }
 0x37d   : > { %v2382_v62 = vpop.eup %2381 }
 0x37e   : > { %v1129_v63 = vsel %vm801_vm3, %v2382_v62, 0.0 }
 0x37f   : > { %1130 = vadd.xlane.f32.xlu1 %v1129_v63 }
 0x3bb   : > { %v1110_v0 = vpop.xlane.xlu1 %1109 }
 0x3bc   : > { %v1118_v1 = vsub.f32 %v1102_v47, %v1110_v0  ;;  %v1456_v47 = vunpack.c.l.s4 %v2598_v46 }
 0x3be   : > { %v1123_v3 = vmul.f32 1.442695, %v1118_v1  ;;  %v1457_v53 = vunpack.c.0.s8 %v1456_v47 }
 0x3bf   : > { %v1113_v5 = vpop.xlane.xlu1 %1112 }
 0x3c0   : > { %2383 = vpow2.f32 %v1123_v3  ;;  %v1119_v6 = vsub.f32 %v1103_v52, %v1113_v5  ;;  %v1488_v52 = vunpack.c.l.s4 %v2599_v51  ;;  %v1460_v60 = vsub.s32 %v1457_v53, %v1459_v54 }
 0x3c2   : > { %v1125_v7 = vmul.f32 1.442695, %v1119_v6  ;;  %v1489_v59 = vunpack.c.0.s8 %v1488_v52 }
 0x3c3   : > { %v1116_v8 = vpop.xlane.xlu0 %1115 }
 0x3c4   : > { %2385 = vpow2.f32 %v1125_v7  ;;  %v1120_v9 = vsub.f32 %v1104_v57, %v1116_v8  ;;  %v1492_v1 = vsub.s32 %v1489_v59, %v1459_v54  ;;  %v2376_v59 = vld [vmem:[%s3148_s16 + $0x8] sm:$0xff]  }
 0x3c6   : > { %v1127_v10 = vmul.f32 1.442695, %v1120_v9 }
 0x3c8   : > { %2387 = vpow2.f32 %v1127_v10 }
 0x3ca   : > { %v2384_v11 = vpop.eup %2383 }
 0x3cb   : > { %v1132_v12 = vsel %vm801_vm3, %v2384_v11, 0.0 }
 0x3cc   : > { %1133 = vadd.xlane.f32.xlu0 %v1132_v12  ;;  %v2373_v12 = vld [vmem:[%s2883_s5] sm:$0xff]  }
 0x3ce   : > { %v2386_v13 = vpop.eup %2385 }
 0x3cf   : > { %v1135_v14 = vsel %vm801_vm3, %v2386_v13, 0.0 }
 0x3d0   : > { %1136 = vadd.xlane.f32.xlu1 %v1135_v14 }
 0x3d2   : > { %v2388_v15 = vpop.eup %2387 }
 0x3d3   : > { %v1138_v16 = vsel %vm801_vm3, %v2388_v15, 0.0 }
 0x3d4   : > { %1139 = vadd.xlane.f32.xlu0 %v1138_v16 }
 0x3e1   : > { %664 = vrot.lane.b32.xlu1 %v641_v34, %s2596_s30 }
 0x3e5   : > { %670 = vrot.lane.b32.xlu1 %v641_v34, %s2595_s28  ;;  %s2461_s28 = scalar_lea.vmem %s3028_s12, 128 }
 0x3e6   : > { %p2462_p10 = scmp.ne.s32.totalorder %s3028_s12, %s2461_s28 }
 0x3e8   : > { %p2463_p7 = pnand %p2462_p10, %p3152_p0 }
 0x3ea   : > { %667 = vrot.lane.b32.xlu0 %v641_v34, %s2597_s9  ;;  %p2464_p9 = pneg %p2463_p7 }
 0x40c   : > { %v1131_v17 = vpop.xlane.xlu1 %1130 }
 0x40d   : > { %2389 = vrcp.f32 %v1131_v17 }
 0x417   : > { %v2390_v18 = vpop.eup %2389 }
 0x418   : > { %v1145_v19 = vmul.f32 %v2390_v18, %v1131_v17 }
 0x41a   : > { %v1149_v20 = vsub.f32 2.0, %v1145_v19 }
 0x41c   : > { %v1153_v21 = vmul.f32 %v2390_v18, %v1149_v20 }
 0x41e   : > { %v1157_v22 = vmul.f32 %v2382_v62, %v1153_v21  ;;  %v2374_v21 = vld [vmem:[%s2883_s5 + $0x8] sm:$0xff]   ;;  %s2600_s5 = smov 16  }
 0x420   : > { %2202 = vmatmul.mubr.msk.f32.vlgmr.msra.gmra.mrb[6].mxu0 %vm801_vm3, %v1157_v22 }
 0x421   : > { %2211 = vmatprep.mubr.msk.f32.mxu0 %vm2594_vm1, %v2593_v2 }
 0x459   : > { %v1134_v23 = vpop.xlane.xlu0 %1133 }
 0x45a   : > { %2391 = vrcp.f32 %v1134_v23 }
 0x45d   : > { %v1137_v24 = vpop.xlane.xlu1 %1136 }
 0x45e   : > { %2393 = vrcp.f32 %v1137_v24 }
 0x461   : > { %v665_v25 = vpop.permute.xlu1 %664  ;;  %v1140_v26 = vpop.xlane.xlu0 %1139 }
 0x462   : > { %2395 = vrcp.f32 %v1140_v26  ;;  %2205 = vmatpush3.msra.mxu1 %v665_v25 }
 0x463   : > { %2214 = vmatprep.subr.mxu1 %v2593_v2 }
 0x464   : > { %v2392_v27 = vpop.eup %2391 }
 0x465   : > { %v1146_v28 = vmul.f32 %v2392_v27, %v1134_v23  ;;  %v668_v29 = vpop.permute.xlu0 %667  ;;  %v671_v39 = vpop.permute.xlu1 %670 }
 0x466   : > { %2210 = vmatpush3.msra.mxu0 %v668_v29 }
 0x467   : > { %v1150_v30 = vsub.f32 2.0, %v1146_v28  ;;  %2219 = vmatprep.subr.bf16.mxu0 %v2593_v2 }
 0x468   : > { %v2394_v31 = vpop.eup %2393 }
 0x469   : > { %v1154_v32 = vmul.f32 %v2392_v27, %v1150_v30  ;;  %v1147_v33 = vmul.f32 %v2394_v31, %v1137_v24 }
 0x46b   : > { %v1158_v34 = vmul.f32 %v2384_v11, %v1154_v32  ;;  %v1151_v35 = vsub.f32 2.0, %v1147_v33 }
 0x46c   : > { %v2396_v36 = vpop.eup %2395 }
 0x46d   : > { %v1155_v37 = vmul.f32 %v2394_v31, %v1151_v35  ;;  %v1148_v38 = vmul.f32 %v2396_v36, %v1140_v26  ;;  %2207 = vmatmul.mubr.msk.f32.vlgmr.msra.gmra.mrb[14].mxu1 %vm801_vm3, %v1158_v34 }
 0x46e   : > { %2215 = vmatpush3.msra.mxu1 %v671_v39  ;;  %2216 = vmatprep.mubr.msk.f32.mxu1 %vm2594_vm1, %v2593_v2 }
 0x46f   : > { %v1159_v40 = vmul.f32 %v2386_v13, %v1155_v37  ;;  %v1152_v41 = vsub.f32 2.0, %v1148_v38  ;;  %2227 = vmatprep.subr.bf16.mxu1 %v2593_v2 }
 0x471   : > { %v1156_v42 = vmul.f32 %v2396_v36, %v1152_v41  ;;  %2212 = vmatmul.mubr.msk.f32.vlgmr.msra.gmra.mrb[8].mxu0 %vm801_vm3, %v1159_v40 }
 0x472   : > { %2223 = vmatprep.mubr.msk.bf16.mxu0 %vm2594_vm1, %v2593_v2  ;;  %2220 = vmatpush3.bf16.msra.mxu0 %v2373_v12 }
 0x473   : > { %v1160_v43 = vmul.f32 %v2388_v15, %v1156_v42  ;;  %2221 = vmatprep.subr.bf16.mxu0 %v2593_v2 }
 0x475   : > { %2217 = vmatmul.mubr.msk.f32.vlgmr.msra.gmra.mrb[16].mxu1 %vm801_vm3, %v1160_v43 }
 0x476   : > { %2231 = vmatprep.mubr.msk.bf16.mxu1 %vm2594_vm1, %v2593_v2  ;;  %2222 = vmatpush3.bf16.msra.mxu0 %v2374_v21 }
 0x477   : > { %2235 = vmatprep.subr.bf16.mxu0 %v2593_v2 }
 0x4f3   : > { %v1230_v44 = vpop.f32.mrb[6].mxu0 }
 0x4f4   : > { %v2203_v45 = vpop.f32.mrb[7].mxu0 }
 0x4f5   : > { %v2093_v45 = vld [vmem:[%s2878_s19 + $0x3] ss:$0 sm:$0xff] }
 0x540   : > { %v1303_v49 = vpop.f32.mrb[14].mxu1 }
 0x541   : > { %v2208_v50 = vpop.f32.mrb[15].mxu1 }
 0x544   : > { %v1376_v55 = vpop.f32.mrb[8].mxu0 }
 0x545   : > { %v1453_v56 = vcombine.low %v1230_v44, %v1376_v55  ;;  %v1454_v57 = vcombine.high %v1230_v44, %v1376_v55  ;;  %v2213_v58 = vpop.f32.mrb[9].mxu0 }
 0x546   : > { %v2375_v58 = vld [vmem:[%s3147_s17] sm:$0xff]  }
 0x547   : > { %v1461_v3 = vrot.slane %v1453_v56, %v1460_v60  ;;  %v1468_v5 = vrot.slane %v1454_v57, %v1460_v60  ;;  %2228 = vmatpush3.bf16.msra.mxu1 %v2375_v58 }
 0x548   : > { %v1449_v61 = vpop.f32.mrb[16].mxu1  ;;  %2229 = vmatprep.subr.bf16.mxu1 %v2593_v2 }
 0x549   : > { %v1469_v62 = vcombine.low %v1303_v49, %v1449_v61  ;;  %v1470_v63 = vcombine.high %v1303_v49, %v1449_v61  ;;  %v2218_v0 = vpop.f32.mrb[17].mxu1 }
 0x54b   : > { %v1477_v6 = vrot.slane %v1469_v62, %v1460_v60  ;;  %v1484_v7 = vrot.slane %v1470_v63, %v1460_v60  ;;  %2230 = vmatpush3.bf16.msra.mxu1 %v2376_v59 }
 0x54d   : > { %v1485_v8 = vcombine.low %v1461_v3, %v1477_v6  ;;  %v1486_v9 = vcombine.high %v1461_v3, %v1477_v6  ;;  %v1501_v10 = vcombine.low %v1468_v5, %v1484_v7  ;;  %v1502_v11 = vcombine.high %v1468_v5, %v1484_v7  ;;  %v2098_v5 = vld [vmem:[%s2878_s19 + $0x5] ss:$0 sm:$0xff] }
 0x54f   : > { %v1493_v13 = vrot.slane %v1485_v8, %v1492_v1  ;;  %v1500_v14 = vrot.slane %v1486_v9, %v1492_v1  ;;  %v1509_v15 = vrot.slane %v1501_v10, %v1492_v1  ;;  %v1516_v16 = vrot.slane %v1502_v11, %v1492_v1  ;;  %v2379_v9 = vld [vmem:[%s2893_s24 + $0x10] sm:$0xff]   ;;  %v2380_v10 = vld [vmem:[%s2893_s24 + $0x18] sm:$0xff]   ;;  %v2099_v11 = vld [vmem:[%s2878_s19 + $0x6] ss:$0 sm:$0xff] }
 0x551   : > { %v1521_v17 = vcombine.low %v1493_v13, %v1500_v14  ;;  %v2091_v18 = vcombine.high %v1493_v13, %v1500_v14  ;;  %v1537_v19 = vcombine.low %v1509_v15, %v1516_v16  ;;  %v2092_v20 = vcombine.high %v1509_v15, %v1516_v16 }
 0x553   : > { %v1528_v22 = vrot.slane %v1521_v17, %v1460_v60  ;;  %v1536_v23 = vrot.slane %v2091_v18, %v1460_v60  ;;  %v1544_v24 = vrot.slane %v1537_v19, %v1460_v60  ;;  %v1552_v25 = vrot.slane %v2092_v20, %v1460_v60  ;;  %v2378_v60 = vld [vmem:[%s2893_s24 + $0x8] sm:$0xff]   ;;  %v2103_v19 = vld [vmem:[%s2878_s19 + $0x7] ss:$0 sm:$0xff] }
 0x555   : > { %v1554_v26 = vcombine.high %v1528_v22, %v1536_v23  ;;  %v1570_v27 = vcombine.high %v1544_v24, %v1552_v25  ;;  %v1553_v28 = vcombine.low %v1528_v22, %v1536_v23  ;;  %v1569_v29 = vcombine.low %v1544_v24, %v1552_v25 }
 0x557   : > { %v1568_v30 = vrot.slane %v1554_v26, %v1492_v1  ;;  %v1584_v31 = vrot.slane %v1570_v27, %v1492_v1  ;;  %v1561_v32 = vrot.slane %v1553_v28, %v1492_v1  ;;  %v1577_v33 = vrot.slane %v1569_v29, %v1492_v1  ;;  %v2097_v1 = vld [vmem:[%s2878_s19 + $0x4] ss:$0 sm:$0xff] }
 0x559   : > { %v1587_v34 = vcombine.low %v1568_v30, %v1584_v31  ;;  %v1586_v35 = vcombine.high %v1561_v32, %v1577_v33  ;;  %v1588_v36 = vcombine.high %v1568_v30, %v1584_v31  ;;  %v1585_v37 = vcombine.low %v1561_v32, %v1577_v33 }
 0x55b   : > { %1594 = vrot.lane.b32.xlu0 %v1587_v34, %s2600_s5  ;;  %1590 = vrot.lane.b32.xlu1 %v1586_v35, %s2601_s7  ;;  %v2109_v35 = vld [vmem:[%s2878_s19 + $0x8] ss:$0 sm:$0xff] }
 0x55f   : > { %1598 = vrot.lane.b32.xlu1 %v1588_v36, %s2602_s21 }
 0x5cd   : > { %v1591_v38 = vpop.permute.xlu1 %1590  ;;  %v1595_v39 = vpop.permute.xlu0 %1594 }
 0x5ce   : > { %v1601_v40 = vsel %vm801_vm3, %v1585_v37, %v1591_v38  ;;  %v2110_v37 = vld [vmem:[%s2878_s19 + $0x9] ss:$0 sm:$0xff] }
 0x5cf   : > { %v1603_v42 = vsel %vm1602_vm4, %v1601_v40, %v1595_v39 }
 0x5d1   : > { %v1599_v41 = vpop.permute.xlu1 %1598 }
 0x5d2   : > { %v1605_v43 = vsel %vm1604_vm5, %v1603_v42, %v1599_v41 }
 0x5d3   : > { %v1606_v44 = vpack.c.bf16 %v1605_v43, %v1605_v43 }
 0x5d5   : > { %2224 = vmatmul.mubr.msk.bf16.vlgmr.msra.gmra.mrb[12].mxu0 %vm480_vm2, %v1606_v44 }
 0x5d6   : > { %2243 = vmatprep.mubr.msk.bf16.mxu0 %vm2594_vm1, %v2593_v2 }
 0x6a8   : > { %v1664_v46 = vpop.f32.mrb[12].mxu0 }
 0x6a9   : > { %v1665_v47 = vadd.f32 %v2093_v45, %v1664_v46  ;;  %v2225_v48 = vpop.f32.mrb[13].mxu0 }
 0x6aa   : > { %v1667_v49 = vpop.f32.mrb[14].mxu0 }
 0x6ab   : > { %v2226_v50 = vpop.f32.mrb[15].mxu0  ;;  %v1670_v51 = vadd.f32 %v1665_v47, %v2906_v4  ;;  %v2377_v4 = vld [vmem:[%s2893_s24] sm:$0xff]   ;;  %s2112_s24 = sshll.u32 %s2575_s8, 7  ;;  %s2603_s8 = smov [#allocation7]  }
 0x6ac   : > { %2236 = vmatpush3.bf16.msra.mxu0 %v2377_v4  ;;  %s3026_s18 = scalar_lea.hbm %s3150_s11, %s2112_s24  ;;  %s2465_s19 = sshll.u32 %s2603_s8, 4  ;;  %s2466_s19 = int_to_ptr.vmem [resolvable:$false] %s2465_s19 }
 0x6ad   : > { %v1671_v52 = vsel %vm480_vm2, %v1670_v51, 0.0  ;;  %2237 = vmatprep.subr.bf16.mxu0 %v2593_v2  ;;  %s2467_s30 = scalar_lea.vmem %s2466_s19, 256  ;;  %p2468_p1 = scmp.lt.s32.totalorder %s3028_s12, %s2466_s19 }
 0x6ae   : > { %1672 = vadd.xlane.f32.xlu0 %v1671_v52  ;;  %p2469_p4 = scmp.lt.s32.totalorder %s2467_s30, %s2461_s28 }
 0x6b0   : > { %2238 = vmatpush3.bf16.msra.mxu0 %v2378_v60  ;;  %p2470_p11 = por %p2469_p4, %p2468_p1 }
 0x6b1   : > { %2239 = vmatprep.subr.bf16.mxu0 %v2593_v2 }
 0x6b2   : > { %p2471_p3 = pnand %p2470_p11, %p2464_p9 }
 0x6b4   : > { %2240 = vmatpush3.bf16.msra.mxu0 %v2379_v9 }
 0x6b5   : > { %2241 = vmatprep.subr.bf16.mxu0 %v2593_v2 }
 0x6b8   : > { %2242 = vmatpush3.bf16.msra.mxu0 %v2380_v10 }
 0x73b   : > { %v1673_v53 = vpop.xlane.xlu0 %1672 }
 0x73c   : > { %v1675_v54 = vmul.f32 0.03125, %v1673_v53 }
 0x73e   : > { %v1676_v55 = vsub.f32 %v1670_v51, %v1675_v54 }
 0x740   : > { %v1677_v56 = vmul.f32 %v1676_v55, %v1676_v55 }
 0x742   : > { %v1678_v57 = vsel %vm480_vm2, %v1677_v56, 0.0 }
 0x743   : > { %1679 = vadd.xlane.f32.xlu1 %v1678_v57 }
 0x7d0   : > { %v1680_v61 = vpop.xlane.xlu1 %1679 }
 0x7d1   : > { %v1681_v62 = vmul.f32 0.03125, %v1680_v61 }
 0x7d3   : > { %v1682_v63 = vadd.f32 1e-12, %v1681_v62 }
 0x7d5   : > { %2397 = vrsqrt.f32 %v1682_v63 }
 0x7df   : > { %v2398_v0 = vpop.eup %2397 }
 0x7e0   : > { %v1684_v3 = vmul.f32 %v2398_v0, %v1676_v55 }
 0x7e2   : > { %v1689_v6 = vmul.f32 %v2097_v1, %v1684_v3 }
 0x7e4   : > { %v1694_v7 = vadd.f32 %v2098_v5, %v1689_v6 }
 0x7e6   : > { %v1695_v8 = vpack.c.bf16 %v1694_v7, %v1694_v7 }
 0x7e8   : > { %2232 = vmatmul.mubr.msk.bf16.vlgmr.msra.gmra.mrb[20].mxu1 %vm480_vm2, %v1695_v8 }
 0x8bb   : > { %v1753_v12 = vpop.f32.mrb[20].mxu1 }
 0x8bc   : > { %v1754_v13 = vadd.f32 %v2099_v11, %v1753_v12  ;;  %v2233_v14 = vpop.f32.mrb[21].mxu1 }
 0x8bd   : > { %v1756_v15 = vpop.f32.mrb[22].mxu1 }
 0x8be   : > { %v1759_v16 = vmax.f32 %v1754_v13, 0.0  ;;  %v2234_v17 = vpop.f32.mrb[23].mxu1 }
 0x8c0   : > { %v1760_v18 = vpack.c.bf16 %v1759_v16, %v1759_v16 }
 0x8c2   : > { %2244 = vmatmul.mubr.msk.bf16.vlgmr.msra.gmra.mrb[16].mxu0 %vm1797_vm6, %v1760_v18 }
 0x995   : > { %v1835_v20 = vpop.f32.mrb[16].mxu0 }
 0x996   : > { %v1836_v21 = vadd.f32 %v2103_v19, %v1835_v20  ;;  %v2245_v22 = vpop.f32.mrb[17].mxu0 }
 0x997   : > { %v1838_v23 = vpop.f32.mrb[18].mxu0 }
 0x998   : > { %v2246_v24 = vpop.f32.mrb[19].mxu0  ;;  %v1841_v2 = vadd.f32 %v1836_v21, %v1694_v7 }
 0x99a   : > { %v1842_v25 = vsel %vm480_vm2, %v1841_v2, 0.0 }
 0x99b   : > { %1843 = vadd.xlane.f32.xlu0 %v1842_v25 }
 0xa28   : > { %v1844_v26 = vpop.xlane.xlu0 %1843 }
 0xa29   : > { %v1845_v27 = vmul.f32 0.03125, %v1844_v26 }
 0xa2b   : > { %v1846_v28 = vsub.f32 %v1841_v2, %v1845_v27 }
 0xa2d   : > { %v1847_v29 = vmul.f32 %v1846_v28, %v1846_v28 }
 0xa2f   : > { %v1848_v30 = vsel %vm480_vm2, %v1847_v29, 0.0 }
 0xa30   : > { %1849 = vadd.xlane.f32.xlu0 %v1848_v30 }
 0xabd   : > { %v1850_v31 = vpop.xlane.xlu0 %1849 }
 0xabe   : > { %v1851_v32 = vmul.f32 0.03125, %v1850_v31 }
 0xac0   : > { %v1852_v33 = vadd.f32 1e-12, %v1851_v32 }
 0xac2   : > { %2399 = vrsqrt.f32 %v1852_v33 }
 0xacc   : > { %v2400_v34 = vpop.eup %2399 }
 0xacd   : > { %v1854_v36 = vmul.f32 %v2400_v34, %v1846_v28 }
 0xacf   : > { %v1859_v38 = vmul.f32 %v2109_v35, %v1854_v36 }
 0xad1   : > { %v1864_v39 = vadd.f32 %v2110_v37, %v1859_v38 }
 0xad3   : > { %1865 = vst.msk [vmem:[%s2895_s20] sm:$0xff] %vm480_vm2, %v1864_v39 }
 0xad4   : > { %2474 = shalt.err (!%p2471_p3)
}
 0xad5   : > { %s2475_s20 = scalar_lea.hbm %s3026_s18, 128  ;;  %s2479_s29 = scalar_lea.hbm %s3151_s13, 256 }
 0xad6   : > { %p2476_p12 = scmp.ne.s32.totalorder %s3026_s18, %s2475_s20  ;;  %p2480_p6 = scmp.lt.u32.totalorder %s3026_s18, %s3151_s13 }
 0xad7   : > { %p2481_p8 = scmp.lt.u32.totalorder %s2479_s29, %s2475_s20  ;;  %p2483_p10 = scmp.lt.u32.totalorder %s2475_s20, %s3026_s18 }
 0xad8   : > { %p2477_p5 = pnand %p2476_p12, %p3152_p0 }
 0xad9   : > { %p2482_p13 = por %p2481_p8, %p2480_p6 }
 0xada   : > { %p2478_p2 = pneg %p2477_p5 }
 0xadb   : > { %p2484_p7 = por %p2483_p10, %p2482_p13 }
 0xadd   : > { %p2485_p9 = pnand %p2484_p7, %p2478_p2 }
 0xadf   : > { %2488 = shalt.err (!%p2485_p9)
}
 0xae0   : > { %2252 = dma.vmem_to_hbm [thread:$0]  (%p3152_p0), %s3028_s12, 128, %s3026_s18, %s1867_s27  }
 0xae1 PF: > { %s3153_s5 = sld [smem:[#allocation16_spill]]  ;;  %s3154_s7 = sld [smem:[#allocation11_spill]] }
 0xae2   : > { %s3155_s21 = sld [smem:[#allocation18_spill]] }
 0xae7   : > { %p2266_p1 = scmp.ge.s32.totalorder %s3153_s5, 2  ;;  %s1892_s17 = sand.u32 1, %s3154_s7  }
 0xae8   : > { %p3156_p4 = scmp.ne.s32.totalorder %s3155_s21, 0  ;;  %s1893_s16 = scalar_lea.sflag [#allocation4], %s1892_s17 }
 0xaea   : > { %p2262_p11 = pnand %p2266_p1, %p3156_p4 }
 0xaec   : > { %2542 = dma.done.wait (!%p2262_p11), %s1893_s16, 128  }
 0xaed   : > { %2544 = vsyncadd (!%p2262_p11), %s1893_s16, 4294967168  ;;  %s26_s11 = sadd.s32 1, %s3153_s5   ;;  %s3157_s14 = sld [smem:[#allocation21_spill]] }
 0xaee   : > { %p23_p3 = scmp.ge.s32.totalorder %s26_s11, 6   ;;  %s3158_s27 = sld [smem:[#allocation12_spill]] }
 0xaef   : > { %s3159_s28 = sld [smem:[#allocation13_spill]]  ;;  %s3160_s29 = sld [smem:[#allocation22_spill]] }
 0xaf0   : > { %s3161_s30 = sld [smem:[#allocation14_spill]]  ;;  %s3162_s8 = sld [smem:[#allocation15_spill]] }
 0xaf1   : > { %s3163_s9 = sld [smem:[#allocation19_spill]]  ;;  %s3164_s10 = sld [smem:[#allocation20_spill]] }
 0xaf2   : > { %s3165_s24 = smov %s2551_s25  ;;  %s3166_s25 = smov %s2555_s26 }
 0xaf3   : > { %s3167_s26 = smov %s3157_s14  ;;  %25 = sbr.rel (!%p23_p3) target bundleno = 15 (0xf), region = 127 }
 0xafa   :  { %1898 = vsyncpa [#allocation3], 1 }
 0xafb   :  { %1900 = vsyncpa [#allocation3 + $0x1], 1 }
 0xafc   :  { %1901 = vsyncpa [#allocation6], 1 }
 0xafd   :  { %1903 = vsyncpa [#allocation6 + $0x1], 1 }
 0xafe   :  { %1904 = vsyncpa [#allocation4], 1 }
 0xaff   :  { %1906 = vsyncpa [#allocation4 + $0x1], 1 }

</bundles_post_ra>
